<compile_context>
chip_gen: v6e
topology: v6e:2x2x1
jax: 0.10.0
libtpu: 0.0.40
codegen_flags: <defaults>
</compile_context>

<pallas_src>
from functools import partial

import jax
import jax.numpy as jnp
from jax import lax
from jax.experimental import pallas as pl
from jax.experimental.pallas import tpu as pltpu


def _round_up(x, m):
    return ((x + m - 1) // m) * m


# --------------------------- Pallas kernel ---------------------------------

def _matmul_bias_relu_kernel(w_ref, x_ref, b_ref, o_ref):
    # w: (Cout, K16) bf16   x: (K16, TM) bf16   b: (Cout, 1) f32
    # o: (Cout, TM) bf16  -- lane-dense output (TM is a multiple of 128).
    acc = jnp.dot(w_ref[...], x_ref[...], preferred_element_type=jnp.float32)
    acc = acc + b_ref[...]                       # per-sublane broadcast add
    o_ref[...] = jnp.maximum(acc, 0.0).astype(o_ref.dtype)


def matmul_bias_relu_t(w_t, x_t, b, tile_m):
    """out[Cout, Mp] = relu(w_t @ x_t + b); bf16 store, f32 accumulation.

    Tiled over M; at this problem size every layer resolves to a single
    full-block call (grid == 1), per the perf review.  For larger M the grid
    auto-pipelines (double-buffered prefetch) and "parallel" lets v7x shard the
    M axis across its two TensorCores.
    """
    Cout, K16 = w_t.shape
    K16x, Mp = x_t.shape
    assert K16 == K16x and Mp % tile_m == 0 and tile_m % 128 == 0
    return pl.pallas_call(
        _matmul_bias_relu_kernel,
        out_shape=jax.ShapeDtypeStruct((Cout, Mp), jnp.bfloat16),
        grid=(Mp // tile_m,),
        in_specs=[
            pl.BlockSpec((Cout, K16), lambda i: (0, 0)),     # weights (resident)
            pl.BlockSpec((K16, tile_m), lambda i: (0, i)),   # patch tile (pipelined)
            pl.BlockSpec((Cout, 1), lambda i: (0, 0)),       # bias
        ],
        out_specs=pl.BlockSpec((Cout, tile_m), lambda i: (0, i)),
        compiler_params=pltpu.CompilerParams(
            dimension_semantics=("parallel",),
            vmem_limit_bytes=32 * 1024 * 1024,   # stays within v7x's 64 MiB VMEM
        ),
    )(w_t, x_t, b)


# ------------------------- layer wrappers (glue) ---------------------------

def conv2d_relu(act_cnhw, w_oihw, b, stride, padding):
    """Conv2d + ReLU on a (Cin, N, H, W) bf16 activation -> (Cout, N, Ho, Wo) bf16."""
    Cin, N, H, W = act_cnhw.shape
    Cout, Cin_w, KH, KW = w_oihw.shape
    assert Cin == Cin_w
    Ho = (H + 2 * padding - KH) // stride + 1
    Wo = (W + 2 * padding - KW) // stride + 1
    K = KH * KW * Cin
    M = N * Ho * Wo

    # im2col glue (XLA), in bf16 so it moves half the HBM bytes.
    xp = jnp.pad(act_cnhw.astype(jnp.bfloat16),
                 ((0, 0), (0, 0), (padding, padding), (padding, padding)))
    cols = []
    for kh in range(KH):
        for kw in range(KW):
            cols.append(xp[:, :, kh:kh + stride * (Ho - 1) + 1:stride,
                              kw:kw + stride * (Wo - 1) + 1:stride])
    # (KK, Cin, N, Ho, Wo) -> (K, M).  K order = (kh, kw, cin), M order =
    # (n, ho, wo), matching the weight reshape below; no transpose needed.
    patches_t = jnp.stack(cols, axis=0).reshape(K, M)

    # Pad K to a multiple of 16 (bf16 sublane packing); size the M tile per
    # layer so tiny tail layers are not padded 16-32x just to reach 256.
    K16 = _round_up(K, 16)
    tile_m = min(512, _round_up(M, 128))
    Mp = _round_up(M, tile_m)
    patches_t = jnp.pad(patches_t, ((0, K16 - K), (0, Mp - M)))

    w_t = jnp.transpose(w_oihw, (0, 2, 3, 1)).reshape(Cout, K)   # (co, kh*kw*cin)
    w_t = jnp.pad(w_t, ((0, 0), (0, K16 - K))).astype(jnp.bfloat16)
    b2 = b.reshape(Cout, 1).astype(jnp.float32)

    out_t = matmul_bias_relu_t(w_t, patches_t, b2, tile_m)       # (Cout, Mp) bf16
    return out_t[:, :M].reshape(Cout, N, Ho, Wo)


def maxpool2d(act_cnhw, k, stride):
    # Review option (a): at these feature-map sizes (<=14x14) a Pallas pool
    # runs at <3% vreg occupancy with masked stores; use one fused XLA
    # reduce_window on the bf16 (C, N, H, W) activation instead (no transposes).
    neg = jnp.array(-jnp.inf, dtype=act_cnhw.dtype)
    return lax.reduce_window(act_cnhw, neg, lax.max,
                             (1, 1, k, k), (1, 1, stride, stride), "VALID")


# ------------------------- AlexNet forward ---------------------------------

def init_params(key, hidden=(16, 32, 32, 64)):
    ks = jax.random.split(key, 8)

    def conv_init(kw, kb, cout, cin, kh, kwid):
        fan_in = cin * kh * kwid
        scale = 1.0 / jnp.sqrt(fan_in)
        w = jax.random.uniform(kw, (cout, cin, kh, kwid), jnp.float32, -scale, scale)
        b = jax.random.uniform(kb, (cout,), jnp.float32, -scale, scale)
        return w, b

    p = {}
    p["w1"], p["b1"] = conv_init(ks[0], ks[1], hidden[0], 3, 11, 11)
    p["w2"], p["b2"] = conv_init(ks[2], ks[3], hidden[1], hidden[0], 5, 5)
    p["w3"], p["b3"] = conv_init(ks[4], ks[5], hidden[2], hidden[1], 3, 3)
    p["w4"], p["b4"] = conv_init(ks[6], ks[7], hidden[3], hidden[2], 3, 3)
    return p


def alexnet_forward(x_nchw, p):
    # NCHW (PyTorch) -> (C, N, H, W) bf16 working layout for all stages.
    x = jnp.transpose(x_nchw, (1, 0, 2, 3)).astype(jnp.bfloat16)
    x = conv2d_relu(x, p["w1"], p["b1"], stride=4, padding=1)   # Conv(3->16, 11, s4, p1)+ReLU
    x = maxpool2d(x, k=3, stride=2)                             # MaxPool(3, 2)
    x = conv2d_relu(x, p["w2"], p["b2"], stride=1, padding=2)   # Conv(16->32, 5, p2)+ReLU
    x = maxpool2d(x, k=3, stride=2)                             # MaxPool(3, 2)
    x = conv2d_relu(x, p["w3"], p["b3"], stride=1, padding=1)   # Conv(32->32, 3, p1)+ReLU
    x = conv2d_relu(x, p["w4"], p["b4"], stride=1, padding=1)   # Conv(32->64, 3, p1)+ReLU
    x = maxpool2d(x, k=2, stride=2)                             # MaxPool(2, 2)
    # Flatten in PyTorch (N, C, H, W) row-major order.
    n = x.shape[1]
    x = jnp.transpose(x, (1, 0, 2, 3)).reshape(n, -1)
    return x.astype(jnp.float32)


# ------------------------- pure-JAX reference ------------------------------
# Mirrors the kernel numerics: bf16 conv operands, f32 accumulation, f32
# bias/ReLU epilogue, bf16 activation storage between layers.

def ref_forward(x_nchw, p):
    def conv(x, w, b, s, pad):
        y = lax.conv_general_dilated(
            x.astype(jnp.bfloat16), w.astype(jnp.bfloat16), (s, s),
            ((pad, pad), (pad, pad)),
            dimension_numbers=("NCHW", "OIHW", "NCHW"),
            preferred_element_type=jnp.float32)
        y = jax.nn.relu(y + b[None, :, None, None])
        return y.astype(jnp.bfloat16)

    def pool(x, k, s):
        neg = jnp.array(-jnp.inf, dtype=x.dtype)
        return lax.reduce_window(x, neg, lax.max, (1, 1, k, k), (1, 1, s, s), "VALID")

    x = x_nchw
    x = conv(x, p["w1"], p["b1"], 4, 1); x = pool(x, 3, 2)
    x = conv(x, p["w2"], p["b2"], 1, 2); x = pool(x, 3, 2)
    x = conv(x, p["w3"], p["b3"], 1, 1)
    x = conv(x, p["w4"], p["b4"], 1, 1); x = pool(x, 2, 2)
    return x.reshape(x.shape[0], -1).astype(jnp.float32)


# ------------------------- main --------------------------------------------

if __name__ == "__main__":
    key = jax.random.PRNGKey(0)
    k_x, k_p = jax.random.split(key)
    # Smallest spatial size for which this AlexNet stack stays valid is ~49;
    # use 64x64 RGB, batch 2.
    x = jax.random.normal(k_x, (2, 3, 64, 64), jnp.float32)
    params = init_params(k_p)

    out = jax.block_until_ready(jax.jit(alexnet_forward)(x, params))
    assert out.shape == (2, 64), out.shape

    ref = jax.block_until_ready(jax.jit(ref_forward)(x, params))
    max_err = float(jnp.max(jnp.abs(out - ref)))
    assert jnp.allclose(out, ref, rtol=2e-2, atol=2e-2), max_err

    print("KERNEL_OK")
</pallas_src>

<mosaic_0001>
module attributes {stable_mosaic.version = 11 : i64} {
  func.func @_matmul_bias_relu_kernel(%arg0: i32, %arg1: memref<16x368xbf16, #tpu.memory_space<vmem>>, %arg2: memref<368x512xbf16, #tpu.memory_space<vmem>>, %arg3: memref<16x1xf32, #tpu.memory_space<vmem>>, %arg4: memref<16x512xbf16, #tpu.memory_space<vmem>>) attributes {dimension_semantics = [#tpu.dimension_semantics<parallel>], iteration_bounds = array<i64: 1>, scalar_prefetch = 0 : i64, scratch_operands = 0 : i64, tpu.core_type = #tpu.core_type<tc>, window_params = [{pipeline_mode = #tpu.pipeline_mode<synchronous>, transform_indices = @transform_0, window_bounds = array<i64: 16, 368>}, {transform_indices = @transform_1, window_bounds = array<i64: 368, 512>}, {pipeline_mode = #tpu.pipeline_mode<synchronous>, transform_indices = @transform_2, window_bounds = array<i64: 16, 1>}, {transform_indices = @transform_3, window_bounds = array<i64: 16, 512>}]} {
    %c0 = arith.constant 0 : index
    %c0_0 = arith.constant 0 : index
    %0 = vector.load %arg1[%c0, %c0_0] : memref<16x368xbf16, #tpu.memory_space<vmem>>, vector<16x368xbf16>
    %c0_1 = arith.constant 0 : index
    %c0_2 = arith.constant 0 : index
    %1 = vector.load %arg2[%c0_1, %c0_2] : memref<368x512xbf16, #tpu.memory_space<vmem>>, vector<368x512xbf16>
    %cst = arith.constant dense<0.000000e+00> : vector<16x512xf32>
    %2 = tpu.matmul %0, %1, %cst {dimension_numbers = #tpu.dot_dimension_numbers<[1], [0], [0], [1], [0, 0, 1, 1], [], []>} : vector<16x368xbf16>, vector<368x512xbf16>, vector<16x512xf32> -> vector<16x512xf32>
    %c0_3 = arith.constant 0 : index
    %c0_4 = arith.constant 0 : index
    %3 = vector.load %arg3[%c0_3, %c0_4] : memref<16x1xf32, #tpu.memory_space<vmem>>, vector<16x1xf32>
    %4 = vector.broadcast %3 : vector<16x1xf32> to vector<16x512xf32>
    %5 = arith.addf %2, %4 : vector<16x512xf32>
    %cst_5 = arith.constant 0.000000e+00 : f32
    %6 = vector.broadcast %cst_5 : f32 to vector<16x512xf32>
    %7 = arith.maximumf %5, %6 : vector<16x512xf32>
    %8 = arith.truncf %7 : vector<16x512xf32> to vector<16x512xbf16>
    %c0_6 = arith.constant 0 : index
    %c0_7 = arith.constant 0 : index
    %9 = vector.load %arg4[%c0_6, %c0_7] : memref<16x512xbf16, #tpu.memory_space<vmem>>, vector<16x512xbf16>
    tpu.vector_store %arg4[%c0_6, %c0_7], %8 {strides = array<i32>} : memref<16x512xbf16, #tpu.memory_space<vmem>>, vector<16x512xbf16>,
    return
  }
  func.func @transform_0(%arg0: i32) -> (i32, i32) {
    %c0_i32 = arith.constant 0 : i32
    %c0_i32_0 = arith.constant 0 : i32
    %c0_i32_1 = arith.constant 0 : i32
    return %c0_i32, %c0_i32_0 : i32, i32
  }
  func.func @transform_1(%arg0: i32) -> (i32, i32) {
    %c0_i32 = arith.constant 0 : i32
    %c0_i32_0 = arith.constant 0 : i32
    return %c0_i32, %arg0 : i32, i32
  }
  func.func @transform_2(%arg0: i32) -> (i32, i32) {
    %c0_i32 = arith.constant 0 : i32
    %c0_i32_0 = arith.constant 0 : i32
    %c0_i32_1 = arith.constant 0 : i32
    return %c0_i32, %c0_i32_0 : i32, i32
  }
  func.func @transform_3(%arg0: i32) -> (i32, i32) {
    %c0_i32 = arith.constant 0 : i32
    %c0_i32_0 = arith.constant 0 : i32
    return %c0_i32, %arg0 : i32, i32
  }
}

module attributes {stable_mosaic.version = 11 : i64} {
  func.func @_matmul_bias_relu_kernel(%arg0: i32, %arg1: memref<32x400xbf16, #tpu.memory_space<vmem>>, %arg2: memref<400x128xbf16, #tpu.memory_space<vmem>>, %arg3: memref<32x1xf32, #tpu.memory_space<vmem>>, %arg4: memref<32x128xbf16, #tpu.memory_space<vmem>>) attributes {dimension_semantics = [#tpu.dimension_semantics<parallel>], iteration_bounds = array<i64: 1>, scalar_prefetch = 0 : i64, scratch_operands = 0 : i64, tpu.core_type = #tpu.core_type<tc>, window_params = [{pipeline_mode = #tpu.pipeline_mode<synchronous>, transform_indices = @transform_0, window_bounds = array<i64: 32, 400>}, {transform_indices = @transform_1, window_bounds = array<i64: 400, 128>}, {pipeline_mode = #tpu.pipeline_mode<synchronous>, transform_indices = @transform_2, window_bounds = array<i64: 32, 1>}, {transform_indices = @transform_3, window_bounds = array<i64: 32, 128>}]} {
    %c0 = arith.constant 0 : index
    %c0_0 = arith.constant 0 : index
    %0 = vector.load %arg1[%c0, %c0_0] : memref<32x400xbf16, #tpu.memory_space<vmem>>, vector<32x400xbf16>
    %c0_1 = arith.constant 0 : index
    %c0_2 = arith.constant 0 : index
    %1 = vector.load %arg2[%c0_1, %c0_2] : memref<400x128xbf16, #tpu.memory_space<vmem>>, vector<400x128xbf16>
    %cst = arith.constant dense<0.000000e+00> : vector<32x128xf32>
    %2 = tpu.matmul %0, %1, %cst {dimension_numbers = #tpu.dot_dimension_numbers<[1], [0], [0], [1], [0, 0, 1, 1], [], []>} : vector<32x400xbf16>, vector<400x128xbf16>, vector<32x128xf32> -> vector<32x128xf32>
    %c0_3 = arith.constant 0 : index
    %c0_4 = arith.constant 0 : index
    %3 = vector.load %arg3[%c0_3, %c0_4] : memref<32x1xf32, #tpu.memory_space<vmem>>, vector<32x1xf32>
    %4 = vector.broadcast %3 : vector<32x1xf32> to vector<32x128xf32>
    %5 = arith.addf %2, %4 : vector<32x128xf32>
    %cst_5 = arith.constant 0.000000e+00 : f32
    %6 = vector.broadcast %cst_5 : f32 to vector<32x128xf32>
    %7 = arith.maximumf %5, %6 : vector<32x128xf32>
    %8 = arith.truncf %7 : vector<32x128xf32> to vector<32x128xbf16>
    %c0_6 = arith.constant 0 : index
    %c0_7 = arith.constant 0 : index
    %9 = vector.load %arg4[%c0_6, %c0_7] : memref<32x128xbf16, #tpu.memory_space<vmem>>, vector<32x128xbf16>
    tpu.vector_store %arg4[%c0_6, %c0_7], %8 {strides = array<i32>} : memref<32x128xbf16, #tpu.memory_space<vmem>>, vector<32x128xbf16>,
    return
  }
  func.func @transform_0(%arg0: i32) -> (i32, i32) {
    %c0_i32 = arith.constant 0 : i32
    %c0_i32_0 = arith.constant 0 : i32
    %c0_i32_1 = arith.constant 0 : i32
    return %c0_i32, %c0_i32_0 : i32, i32
  }
  func.func @transform_1(%arg0: i32) -> (i32, i32) {
    %c0_i32 = arith.constant 0 : i32
    %c0_i32_0 = arith.constant 0 : i32
    return %c0_i32, %arg0 : i32, i32
  }
  func.func @transform_2(%arg0: i32) -> (i32, i32) {
    %c0_i32 = arith.constant 0 : i32
    %c0_i32_0 = arith.constant 0 : i32
    %c0_i32_1 = arith.constant 0 : i32
    return %c0_i32, %c0_i32_0 : i32, i32
  }
  func.func @transform_3(%arg0: i32) -> (i32, i32) {
    %c0_i32 = arith.constant 0 : i32
    %c0_i32_0 = arith.constant 0 : i32
    return %c0_i32, %arg0 : i32, i32
  }
}

module attributes {stable_mosaic.version = 11 : i64} {
  func.func @_matmul_bias_relu_kernel(%arg0: i32, %arg1: memref<32x288xbf16, #tpu.memory_space<vmem>>, %arg2: memref<288x128xbf16, #tpu.memory_space<vmem>>, %arg3: memref<32x1xf32, #tpu.memory_space<vmem>>, %arg4: memref<32x128xbf16, #tpu.memory_space<vmem>>) attributes {dimension_semantics = [#tpu.dimension_semantics<parallel>], iteration_bounds = array<i64: 1>, scalar_prefetch = 0 : i64, scratch_operands = 0 : i64, tpu.core_type = #tpu.core_type<tc>, window_params = [{pipeline_mode = #tpu.pipeline_mode<synchronous>, transform_indices = @transform_0, window_bounds = array<i64: 32, 288>}, {transform_indices = @transform_1, window_bounds = array<i64: 288, 128>}, {pipeline_mode = #tpu.pipeline_mode<synchronous>, transform_indices = @transform_2, window_bounds = array<i64: 32, 1>}, {transform_indices = @transform_3, window_bounds = array<i64: 32, 128>}]} {
    %c0 = arith.constant 0 : index
    %c0_0 = arith.constant 0 : index
    %0 = vector.load %arg1[%c0, %c0_0] : memref<32x288xbf16, #tpu.memory_space<vmem>>, vector<32x288xbf16>
    %c0_1 = arith.constant 0 : index
    %c0_2 = arith.constant 0 : index
    %1 = vector.load %arg2[%c0_1, %c0_2] : memref<288x128xbf16, #tpu.memory_space<vmem>>, vector<288x128xbf16>
    %cst = arith.constant dense<0.000000e+00> : vector<32x128xf32>
    %2 = tpu.matmul %0, %1, %cst {dimension_numbers = #tpu.dot_dimension_numbers<[1], [0], [0], [1], [0, 0, 1, 1], [], []>} : vector<32x288xbf16>, vector<288x128xbf16>, vector<32x128xf32> -> vector<32x128xf32>
    %c0_3 = arith.constant 0 : index
    %c0_4 = arith.constant 0 : index
    %3 = vector.load %arg3[%c0_3, %c0_4] : memref<32x1xf32, #tpu.memory_space<vmem>>, vector<32x1xf32>
    %4 = vector.broadcast %3 : vector<32x1xf32> to vector<32x128xf32>
    %5 = arith.addf %2, %4 : vector<32x128xf32>
    %cst_5 = arith.constant 0.000000e+00 : f32
    %6 = vector.broadcast %cst_5 : f32 to vector<32x128xf32>
    %7 = arith.maximumf %5, %6 : vector<32x128xf32>
    %8 = arith.truncf %7 : vector<32x128xf32> to vector<32x128xbf16>
    %c0_6 = arith.constant 0 : index
    %c0_7 = arith.constant 0 : index
    %9 = vector.load %arg4[%c0_6, %c0_7] : memref<32x128xbf16, #tpu.memory_space<vmem>>, vector<32x128xbf16>
    tpu.vector_store %arg4[%c0_6, %c0_7], %8 {strides = array<i32>} : memref<32x128xbf16, #tpu.memory_space<vmem>>, vector<32x128xbf16>,
    return
  }
  func.func @transform_0(%arg0: i32) -> (i32, i32) {
    %c0_i32 = arith.constant 0 : i32
    %c0_i32_0 = arith.constant 0 : i32
    %c0_i32_1 = arith.constant 0 : i32
    return %c0_i32, %c0_i32_0 : i32, i32
  }
  func.func @transform_1(%arg0: i32) -> (i32, i32) {
    %c0_i32 = arith.constant 0 : i32
    %c0_i32_0 = arith.constant 0 : i32
    return %c0_i32, %arg0 : i32, i32
  }
  func.func @transform_2(%arg0: i32) -> (i32, i32) {
    %c0_i32 = arith.constant 0 : i32
    %c0_i32_0 = arith.constant 0 : i32
    %c0_i32_1 = arith.constant 0 : i32
    return %c0_i32, %c0_i32_0 : i32, i32
  }
  func.func @transform_3(%arg0: i32) -> (i32, i32) {
    %c0_i32 = arith.constant 0 : i32
    %c0_i32_0 = arith.constant 0 : i32
    return %c0_i32, %arg0 : i32, i32
  }
}

module attributes {stable_mosaic.version = 11 : i64} {
  func.func @_matmul_bias_relu_kernel(%arg0: i32, %arg1: memref<64x288xbf16, #tpu.memory_space<vmem>>, %arg2: memref<288x128xbf16, #tpu.memory_space<vmem>>, %arg3: memref<64x1xf32, #tpu.memory_space<vmem>>, %arg4: memref<64x128xbf16, #tpu.memory_space<vmem>>) attributes {dimension_semantics = [#tpu.dimension_semantics<parallel>], iteration_bounds = array<i64: 1>, scalar_prefetch = 0 : i64, scratch_operands = 0 : i64, tpu.core_type = #tpu.core_type<tc>, window_params = [{pipeline_mode = #tpu.pipeline_mode<synchronous>, transform_indices = @transform_0, window_bounds = array<i64: 64, 288>}, {transform_indices = @transform_1, window_bounds = array<i64: 288, 128>}, {pipeline_mode = #tpu.pipeline_mode<synchronous>, transform_indices = @transform_2, window_bounds = array<i64: 64, 1>}, {transform_indices = @transform_3, window_bounds = array<i64: 64, 128>}]} {
    %c0 = arith.constant 0 : index
    %c0_0 = arith.constant 0 : index
    %0 = vector.load %arg1[%c0, %c0_0] : memref<64x288xbf16, #tpu.memory_space<vmem>>, vector<64x288xbf16>
    %c0_1 = arith.constant 0 : index
    %c0_2 = arith.constant 0 : index
    %1 = vector.load %arg2[%c0_1, %c0_2] : memref<288x128xbf16, #tpu.memory_space<vmem>>, vector<288x128xbf16>
    %cst = arith.constant dense<0.000000e+00> : vector<64x128xf32>
    %2 = tpu.matmul %0, %1, %cst {dimension_numbers = #tpu.dot_dimension_numbers<[1], [0], [0], [1], [0, 0, 1, 1], [], []>} : vector<64x288xbf16>, vector<288x128xbf16>, vector<64x128xf32> -> vector<64x128xf32>
    %c0_3 = arith.constant 0 : index
    %c0_4 = arith.constant 0 : index
    %3 = vector.load %arg3[%c0_3, %c0_4] : memref<64x1xf32, #tpu.memory_space<vmem>>, vector<64x1xf32>
    %4 = vector.broadcast %3 : vector<64x1xf32> to vector<64x128xf32>
    %5 = arith.addf %2, %4 : vector<64x128xf32>
    %cst_5 = arith.constant 0.000000e+00 : f32
    %6 = vector.broadcast %cst_5 : f32 to vector<64x128xf32>
    %7 = arith.maximumf %5, %6 : vector<64x128xf32>
    %8 = arith.truncf %7 : vector<64x128xf32> to vector<64x128xbf16>
    %c0_6 = arith.constant 0 : index
    %c0_7 = arith.constant 0 : index
    %9 = vector.load %arg4[%c0_6, %c0_7] : memref<64x128xbf16, #tpu.memory_space<vmem>>, vector<64x128xbf16>
    tpu.vector_store %arg4[%c0_6, %c0_7], %8 {strides = array<i32>} : memref<64x128xbf16, #tpu.memory_space<vmem>>, vector<64x128xbf16>,
    return
  }
  func.func @transform_0(%arg0: i32) -> (i32, i32) {
    %c0_i32 = arith.constant 0 : i32
    %c0_i32_0 = arith.constant 0 : i32
    %c0_i32_1 = arith.constant 0 : i32
    return %c0_i32, %c0_i32_0 : i32, i32
  }
  func.func @transform_1(%arg0: i32) -> (i32, i32) {
    %c0_i32 = arith.constant 0 : i32
    %c0_i32_0 = arith.constant 0 : i32
    return %c0_i32, %arg0 : i32, i32
  }
  func.func @transform_2(%arg0: i32) -> (i32, i32) {
    %c0_i32 = arith.constant 0 : i32
    %c0_i32_0 = arith.constant 0 : i32
    %c0_i32_1 = arith.constant 0 : i32
    return %c0_i32, %c0_i32_0 : i32, i32
  }
  func.func @transform_3(%arg0: i32) -> (i32, i32) {
    %c0_i32 = arith.constant 0 : i32
    %c0_i32_0 = arith.constant 0 : i32
    return %c0_i32, %arg0 : i32, i32
  }
}

</mosaic_0001>

<bundles_post_ra>
// kernel: alexnet_forward.4
= control target key start
LH: loop header
LB: loop body
LE: loop exit
PB: predicated region body
PF: predicated region fallthrough
CT: control target
= control target key end

     0   :  { %v1063_v1 = vmov 0   ;;  %vm598_vm0 = vcmask 916480   ;;  %s1396_s1 = inlined_call_operand.vmem [shape: bf16[368,512], index: 1, kind: input, shape index: {}]   ;;  %s1397_s0 = inlined_call_operand.vmem [shape: bf16[16,368], index: 0, kind: input, shape index: {}]   ;;  %s1398_s2 = inlined_call_operand.vmem [shape: f32[16,1], index: 2, kind: input, shape index: {}]   ;;  %s1399_s3 = inlined_call_operand.vmem [shape: bf16[16,512], index: 3, kind: output, shape index: {}]  }
   0x1   :  { %v921_v0 = vld [vmem:[%s1396_s1 + $0xe4] ss:$16 sps:$4 sm:$0xff]   ;;  %677 = vmatprep.mubr.bf16.mxu1 %v1063_v1  ;;  %920 = vset.pattern.permute.xlu0 %v1063_v1  ;;  %v925_v3 = vld [vmem:[%s1396_s1 + $0xe0] ss:$16 sps:$4 sm:$0xff]   ;;  %v968_v30 = vld [vmem:[%s1396_s1 + $0xec] ss:$16 sps:$4 sm:$0xff]  }
   0x2   :  { %v923_v2 = vld [vmem:[%s1396_s1 + $0x2c4] ss:$16 sps:$4 sm:$0xff]   ;;  %602 = vmatprep.subr.bf16.mxu0 %v921_v0  ;;  %v926_v4 = vld [vmem:[%s1396_s1 + $0x2c0] ss:$16 sps:$4 sm:$0xff]   ;;  %v966_v32 = vld [vmem:[%s1396_s1 + $0xe8] ss:$16 sps:$4 sm:$0xff]  }
   0x3   :  { %647 = vmatprep.subr.bf16.mxu1 %v923_v2  ;;  %v927_v5 = vld [vmem:[%s1396_s1 + $0xc4] ss:$16 sps:$4 sm:$0xff]   ;;  %603 = vmatpush1.bf16.msra.mxu0 %v925_v3  ;;  %v931_v7 = vld [vmem:[%s1396_s1 + $0xc0] ss:$16 sps:$4 sm:$0xff]   ;;  %v974_v35 = vld [vmem:[%s1396_s1 + $0xcc] ss:$16 sps:$4 sm:$0xff]  }
   0x4   :  { %648 = vmatpush1.bf16.msra.mxu1 %v926_v4  ;;  %v929_v6 = vld [vmem:[%s1396_s1 + $0x2a4] ss:$16 sps:$4 sm:$0xff]   ;;  %604 = vmatprep.subr.bf16.mxu0 %v927_v5  ;;  %v932_v8 = vld [vmem:[%s1396_s1 + $0x2a0] ss:$16 sps:$4 sm:$0xff]   ;;  %v972_v36 = vld [vmem:[%s1396_s1 + $0xc8] ss:$16 sps:$4 sm:$0xff]  }
   0x5   :  { %649 = vmatprep.subr.bf16.mxu1 %v929_v6  ;;  %v933_v9 = vld [vmem:[%s1396_s1 + $0xa4] ss:$16 sps:$4 sm:$0xff]   ;;  %v937_v11 = vld [vmem:[%s1396_s1 + $0xa0] ss:$16 sps:$4 sm:$0xff]   ;;  %v980_v39 = vld [vmem:[%s1396_s1 + $0xac] ss:$16 sps:$4 sm:$0xff]  }
   0x6   :  { %v935_v10 = vld [vmem:[%s1396_s1 + $0x284] ss:$16 sps:$4 sm:$0xff]   ;;  %v938_v12 = vld [vmem:[%s1396_s1 + $0x280] ss:$16 sps:$4 sm:$0xff]   ;;  %v978_v40 = vld [vmem:[%s1396_s1 + $0xa8] ss:$16 sps:$4 sm:$0xff]  }
   0x7   :  { %605 = vmatpush1.bf16.msra.mxu0 %v931_v7  ;;  %v939_v13 = vld [vmem:[%s1396_s1 + $0x84] ss:$16 sps:$4 sm:$0xff]   ;;  %v943_v15 = vld [vmem:[%s1396_s1 + $0x80] ss:$16 sps:$4 sm:$0xff]   ;;  %v986_v43 = vld [vmem:[%s1396_s1 + $0x8c] ss:$16 sps:$4 sm:$0xff]  }
   0x8   :  { %650 = vmatpush1.bf16.msra.mxu1 %v932_v8  ;;  %606 = vmatprep.subr.bf16.mxu0 %v933_v9  ;;  %v941_v14 = vld [vmem:[%s1396_s1 + $0x264] ss:$16 sps:$4 sm:$0xff]   ;;  %v944_v16 = vld [vmem:[%s1396_s1 + $0x260] ss:$16 sps:$4 sm:$0xff]   ;;  %v984_v44 = vld [vmem:[%s1396_s1 + $0x88] ss:$16 sps:$4 sm:$0xff]  }
   0x9   :  { %651 = vmatprep.subr.bf16.mxu1 %v935_v10  ;;  %v945_v17 = vld [vmem:[%s1396_s1 + $0x64] ss:$16 sps:$4 sm:$0xff]   ;;  %v949_v19 = vld [vmem:[%s1396_s1 + $0x60] ss:$16 sps:$4 sm:$0xff]   ;;  %v992_v47 = vld [vmem:[%s1396_s1 + $0x6c] ss:$16 sps:$4 sm:$0xff]  }
   0xa   :  { %v947_v18 = vld [vmem:[%s1396_s1 + $0x244] ss:$16 sps:$4 sm:$0xff]   ;;  %v950_v20 = vld [vmem:[%s1396_s1 + $0x240] ss:$16 sps:$4 sm:$0xff]   ;;  %v990_v48 = vld [vmem:[%s1396_s1 + $0x68] ss:$16 sps:$4 sm:$0xff]  }
   0xb   :  { %607 = vmatpush1.bf16.msra.mxu0 %v937_v11  ;;  %v951_v21 = vld [vmem:[%s1396_s1 + $0x44] ss:$16 sps:$4 sm:$0xff]   ;;  %v955_v23 = vld [vmem:[%s1396_s1 + $0x40] ss:$16 sps:$4 sm:$0xff]   ;;  %v998_v52 = vld [vmem:[%s1396_s1 + $0x4c] ss:$16 sps:$4 sm:$0xff]  }
   0xc   :  { %652 = vmatpush1.bf16.msra.mxu1 %v938_v12  ;;  %608 = vmatprep.subr.bf16.mxu0 %v939_v13  ;;  %v953_v22 = vld [vmem:[%s1396_s1 + $0x224] ss:$16 sps:$4 sm:$0xff]   ;;  %v956_v24 = vld [vmem:[%s1396_s1 + $0x220] ss:$16 sps:$4 sm:$0xff]   ;;  %v996_v53 = vld [vmem:[%s1396_s1 + $0x48] ss:$16 sps:$4 sm:$0xff]  }
   0xd   :  { %653 = vmatprep.subr.bf16.mxu1 %v941_v14  ;;  %v957_v25 = vld [vmem:[%s1396_s1 + $0x24] ss:$16 sps:$4 sm:$0xff]   ;;  %v961_v27 = vld [vmem:[%s1396_s1 + $0x20] ss:$16 sps:$4 sm:$0xff]   ;;  %v1004_v56 = vld [vmem:[%s1396_s1 + $0x2c] ss:$16 sps:$4 sm:$0xff]  }
   0xe   :  { %v959_v26 = vld [vmem:[%s1396_s1 + $0x204] ss:$16 sps:$4 sm:$0xff]   ;;  %v962_v28 = vld [vmem:[%s1396_s1 + $0x200] ss:$16 sps:$4 sm:$0xff]   ;;  %v1002_v57 = vld [vmem:[%s1396_s1 + $0x28] ss:$16 sps:$4 sm:$0xff]  }
   0xf   :  { %609 = vmatpush1.bf16.msra.mxu0 %v943_v15  ;;  %v963_v29 = vld [vmem:[%s1396_s1 + $0x4] ss:$16 sps:$4 sm:$0xff]   ;;  %v969_v33 = vld [vmem:[%s1396_s1] ss:$16 sps:$4 sm:$0xff]   ;;  %v1010_v60 = vld [vmem:[%s1396_s1 + $0xc] ss:$16 sps:$4 sm:$0xff]  }
  0x10   :  { %654 = vmatpush1.bf16.msra.mxu1 %v944_v16  ;;  %610 = vmatprep.subr.bf16.mxu0 %v945_v17  ;;  %v1179_v31 = vld [vmem:[%s1397_s0 + $0x8] ss:$12 sps:$4 sm:$0xff]   ;;  %v975_v37 = vld [vmem:[%s1396_s1 + $0x1e0] ss:$16 sps:$4 sm:$0xff]   ;;  %v1016_v0 = vld [vmem:[%s1396_s1 + $0x1ec] ss:$16 sps:$4 sm:$0xff]  }
  0x11   :  { %655 = vmatprep.subr.bf16.mxu1 %v947_v18  ;;  %v970_v34 = vld [vmem:[%s1396_s1 + $0x1e4] ss:$16 sps:$4 sm:$0xff]   ;;  %v981_v41 = vld [vmem:[%s1396_s1 + $0x1c0] ss:$16 sps:$4 sm:$0xff]   ;;  %v1008_v61 = vld [vmem:[%s1396_s1 + $0x8] ss:$16 sps:$4 sm:$0xff]  }
  0x12   :  { %v976_v38 = vld [vmem:[%s1396_s1 + $0x1c4] ss:$16 sps:$4 sm:$0xff]   ;;  %v987_v45 = vld [vmem:[%s1396_s1 + $0x1a0] ss:$16 sps:$4 sm:$0xff]   ;;  %v1014_v2 = vld [vmem:[%s1396_s1 + $0x1e8] ss:$16 sps:$4 sm:$0xff]  }
  0x13   :  { %611 = vmatpush1.bf16.msra.mxu0 %v949_v19  ;;  %v982_v42 = vld [vmem:[%s1396_s1 + $0x1a4] ss:$16 sps:$4 sm:$0xff]   ;;  %v993_v49 = vld [vmem:[%s1396_s1 + $0x180] ss:$16 sps:$4 sm:$0xff]   ;;  %v1023_v4 = vld [vmem:[%s1396_s1 + $0x1cc] ss:$16 sps:$4 sm:$0xff]  }
  0x14   :  { %656 = vmatpush1.bf16.msra.mxu1 %v950_v20  ;;  %612 = vmatprep.subr.bf16.mxu0 %v951_v21  ;;  %v988_v46 = vld [vmem:[%s1396_s1 + $0x184] ss:$16 sps:$4 sm:$0xff]   ;;  %v999_v54 = vld [vmem:[%s1396_s1 + $0x160] ss:$16 sps:$4 sm:$0xff]   ;;  %v1026_v5 = vld [vmem:[%s1396_s1 + $0x2cc] ss:$16 sps:$4 sm:$0xff]  }
  0x15   :  { %657 = vmatprep.subr.bf16.mxu1 %v953_v22  ;;  %v994_v50 = vld [vmem:[%s1396_s1 + $0x164] ss:$16 sps:$4 sm:$0xff]   ;;  %v1005_v58 = vld [vmem:[%s1396_s1 + $0x140] ss:$16 sps:$4 sm:$0xff]   ;;  %v1021_v8 = vld [vmem:[%s1396_s1 + $0x1c8] ss:$16 sps:$4 sm:$0xff]  }
  0x16   :  { %v1020_v51 = vld [vmem:[%s1397_s0 + $0x4] ss:$12 sps:$4 sm:$0xff]   ;;  %v1018_v6 = vld [vmem:[%s1397_s0] ss:$12 sps:$4 sm:$0xff]   ;;  %v1024_v9 = vld [vmem:[%s1396_s1 + $0x2c8] ss:$16 sps:$4 sm:$0xff]  }
  0x17   :  { %613 = vmatpush1.bf16.msra.mxu0 %v955_v23  ;;  %634 = vmatprep.mubr.bf16.mxu0 %v1020_v51  ;;  %v1000_v55 = vld [vmem:[%s1396_s1 + $0x144] ss:$16 sps:$4 sm:$0xff]   ;;  %v1011_v62 = vld [vmem:[%s1396_s1 + $0x120] ss:$16 sps:$4 sm:$0xff]   ;;  %v1029_v10 = vld [vmem:[%s1396_s1 + $0x1ac] ss:$16 sps:$4 sm:$0xff]  }
  0x18   :  { %658 = vmatpush1.bf16.msra.mxu1 %v956_v24  ;;  %614 = vmatprep.subr.bf16.mxu0 %v957_v25  ;;  %v1006_v59 = vld [vmem:[%s1396_s1 + $0x124] ss:$16 sps:$4 sm:$0xff]   ;;  %v1017_v3 = vld [vmem:[%s1396_s1 + $0x100] ss:$16 sps:$4 sm:$0xff]   ;;  %v1032_v11 = vld [vmem:[%s1396_s1 + $0x2ac] ss:$16 sps:$4 sm:$0xff]  }
  0x19   :  { %659 = vmatprep.subr.bf16.mxu1 %v959_v26  ;;  %v1012_v63 = vld [vmem:[%s1396_s1 + $0x104] ss:$16 sps:$4 sm:$0xff]   ;;  %v112_v12 = vld [vmem:[%s1398_s2 + $0x8] sm:$0xff] }
  0x1a   :  { %v111_v7 = vld [vmem:[%s1398_s2] sm:$0xff]  ;;  %v1027_v13 = vld [vmem:[%s1396_s1 + $0x1a8] ss:$16 sps:$4 sm:$0xff]   ;;  %v1035_v15 = vld [vmem:[%s1396_s1 + $0x18c] ss:$16 sps:$4 sm:$0xff]  }
  0x1b   :  { %615 = vmatpush1.bf16.msra.mxu0 %v961_v27  ;;  %115 = vperm.xlu0 %920, %v111_v7   ;;  %v1030_v14 = vld [vmem:[%s1396_s1 + $0x2a8] ss:$16 sps:$4 sm:$0xff]   ;;  %v1038_v16 = vld [vmem:[%s1396_s1 + $0x28c] ss:$16 sps:$4 sm:$0xff]  }
  0x1c   :  { %660 = vmatpush1.bf16.msra.mxu1 %v962_v28  ;;  %616 = vmatprep.subr.bf16.mxu0 %v963_v29  ;;  %v1033_v17 = vld [vmem:[%s1396_s1 + $0x188] ss:$16 sps:$4 sm:$0xff]   ;;  %v1041_v19 = vld [vmem:[%s1396_s1 + $0x16c] ss:$16 sps:$4 sm:$0xff]  }
  0x1d   :  { %688 = vmatprep.subr.bf16.mxu1 %v968_v30  ;;  %v1036_v18 = vld [vmem:[%s1396_s1 + $0x288] ss:$16 sps:$4 sm:$0xff]   ;;  %v1047_v22 = vld [vmem:[%s1396_s1 + $0x14c] ss:$16 sps:$4 sm:$0xff]  }
  0x1e   :  { %v1039_v20 = vld [vmem:[%s1396_s1 + $0x168] ss:$16 sps:$4 sm:$0xff]   ;;  %v1050_v23 = vld [vmem:[%s1396_s1 + $0x24c] ss:$16 sps:$4 sm:$0xff]  }
  0x1f   :  { %909 = vmatmul.mubr.msk.bf16.vlgmr.msra.gmra.mxu1 %vm598_vm0, %v1179_v31  ;;  %617 = vmatpush1.bf16.msra.mxu0 %v969_v33  ;;  %v1042_v21 = vld [vmem:[%s1396_s1 + $0x268] ss:$16 sps:$4 sm:$0xff]   ;;  %v1053_v26 = vld [vmem:[%s1396_s1 + $0x12c] ss:$16 sps:$4 sm:$0xff]  }
  0x20   :  { %689 = vmatpush1.bf16.msra.mxu1 %v966_v32  ;;  %618 = vmatprep.subr.bf16.mxu0 %v970_v34  ;;  %v1045_v24 = vld [vmem:[%s1396_s1 + $0x148] ss:$16 sps:$4 sm:$0xff]   ;;  %v1056_v27 = vld [vmem:[%s1396_s1 + $0x22c] ss:$16 sps:$4 sm:$0xff]  }
  0x21   :  { %690 = vmatprep.subr.bf16.mxu1 %v974_v35  ;;  %720 = vmatprep.mubr.bf16.mxu1 %v1020_v51  ;;  %v1048_v25 = vld [vmem:[%s1396_s1 + $0x248] ss:$16 sps:$4 sm:$0xff]   ;;  %v1059_v30 = vld [vmem:[%s1396_s1 + $0x10c] ss:$16 sps:$4 sm:$0xff]  }
  0x22   :  { %120 = vperm.xlu0 %920, %v112_v12   ;;  %v1051_v28 = vld [vmem:[%s1396_s1 + $0x128] ss:$16 sps:$4 sm:$0xff]   ;;  %v1062_v32 = vld [vmem:[%s1396_s1 + $0x20c] ss:$16 sps:$4 sm:$0xff]  }
  0x23   :  { %619 = vmatpush2.bf16.msra.mxu0 %v975_v37  ;;  %v1054_v29 = vld [vmem:[%s1396_s1 + $0x228] ss:$16 sps:$4 sm:$0xff]  }
  0x24   :  { %691 = vmatpush1.bf16.msra.mxu1 %v972_v36  ;;  %620 = vmatprep.subr.bf16.mxu0 %v976_v38  ;;  %v1057_v33 = vld [vmem:[%s1396_s1 + $0x108] ss:$16 sps:$4 sm:$0xff]  }
  0x25   :  { %692 = vmatprep.subr.bf16.mxu1 %v980_v39  ;;  %v1060_v34 = vld [vmem:[%s1396_s1 + $0x208] ss:$16 sps:$4 sm:$0xff]  }
  0x27   :  { %621 = vmatpush2.bf16.msra.mxu0 %v981_v41 }
  0x28   :  { %693 = vmatpush1.bf16.msra.mxu1 %v978_v40  ;;  %622 = vmatprep.subr.bf16.mxu0 %v982_v42 }
  0x29   :  { %694 = vmatprep.subr.bf16.mxu1 %v986_v43 }
  0x2b   :  { %623 = vmatpush2.bf16.msra.mxu0 %v987_v45 }
  0x2c   :  { %695 = vmatpush1.bf16.msra.mxu1 %v984_v44  ;;  %624 = vmatprep.subr.bf16.mxu0 %v988_v46 }
  0x2d   :  { %696 = vmatprep.subr.bf16.mxu1 %v992_v47 }
  0x2f   :  { %625 = vmatpush2.bf16.msra.mxu0 %v993_v49 }
  0x30   :  { %697 = vmatpush1.bf16.msra.mxu1 %v990_v48  ;;  %626 = vmatprep.subr.bf16.mxu0 %v994_v50 }
  0x31   :  { %698 = vmatprep.subr.bf16.mxu1 %v998_v52 }
  0x33   :  { %627 = vmatpush2.bf16.msra.mxu0 %v999_v54 }
  0x34   :  { %699 = vmatpush1.bf16.msra.mxu1 %v996_v53  ;;  %628 = vmatprep.subr.bf16.mxu0 %v1000_v55 }
  0x35   :  { %700 = vmatprep.subr.bf16.mxu1 %v1004_v56 }
  0x37   :  { %629 = vmatpush2.bf16.msra.mxu0 %v1005_v58 }
  0x38   :  { %701 = vmatpush1.bf16.msra.mxu1 %v1002_v57  ;;  %630 = vmatprep.subr.bf16.mxu0 %v1006_v59 }
  0x39   :  { %702 = vmatprep.subr.bf16.mxu1 %v1010_v60 }
  0x3b   :  { %631 = vmatpush2.bf16.msra.mxu0 %v1011_v62 }
  0x3c   :  { %703 = vmatpush1.bf16.msra.mxu1 %v1008_v61  ;;  %632 = vmatprep.subr.bf16.mxu0 %v1012_v63 }
  0x3d   :  { %704 = vmatprep.subr.bf16.mxu1 %v1016_v0 }
  0x3f   :  { %633 = vmatpush2.bf16.msra.mxu0 %v1017_v3 }
  0x40   :  { %705 = vmatpush2.bf16.msra.mxu1 %v1014_v2  ;;  %733 = vmatprep.subr.bf16.mxu0 %v1026_v5 }
  0x41   :  { %706 = vmatprep.subr.bf16.mxu1 %v1023_v4 }
  0x42   :  { %635 = vmatmul.mubr.bf16.vlgmr.msra.gmra.mxu0 %v1018_v6 }
  0x43   :  { %734 = vmatpush1.bf16.msra.mxu0 %v1024_v9  ;;  %763 = vmatprep.mubr.bf16.mxu0 %v1063_v1  ;;  %v1044_v1 = vld [vmem:[%s1396_s1 + $0x26c] ss:$16 sps:$4 sm:$0xff]  }
  0x44   :  { %707 = vmatpush2.bf16.msra.mxu1 %v1021_v8  ;;  %735 = vmatprep.subr.bf16.mxu0 %v1032_v11 }
  0x45   :  { %708 = vmatprep.subr.bf16.mxu1 %v1029_v10 }
  0x47   :  { %736 = vmatpush1.bf16.msra.mxu0 %v1030_v14 }
  0x48   :  { %709 = vmatpush2.bf16.msra.mxu1 %v1027_v13  ;;  %737 = vmatprep.subr.bf16.mxu0 %v1038_v16 }
  0x49   :  { %710 = vmatprep.subr.bf16.mxu1 %v1035_v15 }
  0x4b   :  { %738 = vmatpush1.bf16.msra.mxu0 %v1036_v18 }
  0x4c   :  { %711 = vmatpush2.bf16.msra.mxu1 %v1033_v17  ;;  %739 = vmatprep.subr.bf16.mxu0 %v1044_v1 }
  0x4d   :  { %712 = vmatprep.subr.bf16.mxu1 %v1041_v19 }
  0x4f   :  { %740 = vmatpush1.bf16.msra.mxu0 %v1042_v21 }
  0x50   :  { %713 = vmatpush2.bf16.msra.mxu1 %v1039_v20  ;;  %741 = vmatprep.subr.bf16.mxu0 %v1050_v23 }
  0x51   :  { %714 = vmatprep.subr.bf16.mxu1 %v1047_v22 }
  0x53   :  { %742 = vmatpush1.bf16.msra.mxu0 %v1048_v25 }
  0x54   :  { %715 = vmatpush2.bf16.msra.mxu1 %v1045_v24  ;;  %743 = vmatprep.subr.bf16.mxu0 %v1056_v27 }
  0x55   :  { %716 = vmatprep.subr.bf16.mxu1 %v1053_v26 }
  0x57   :  { %744 = vmatpush1.bf16.msra.mxu0 %v1054_v29 }
  0x58   :  { %717 = vmatpush2.bf16.msra.mxu1 %v1051_v28  ;;  %745 = vmatprep.subr.bf16.mxu0 %v1062_v32 }
  0x59   :  { %718 = vmatprep.subr.bf16.mxu1 %v1059_v30 }
  0x5b   :  { %746 = vmatpush1.bf16.msra.mxu0 %v1060_v34 }
  0x5c   :  { %719 = vmatpush2.bf16.msra.mxu1 %v1057_v33 }
  0x5e   :  { %910 = vmatmul.mubr.msk.bf16.vlgmr.msra.gmra.mxu0 %vm598_vm0, %v1179_v31 }
  0x5f   :  { %721 = vmatmul.mubr.bf16.vlgmr.msra.gmra.mxu1 %v1018_v6 }
  0x96   :  { %v116_v36 = vpop.permute.xlu0 %115 }
  0x9d   :  { %v121_v41 = vpop.permute.xlu0 %120 }
  0xdf   :  { %v679_v35 = vpop.f32.mrf.mxu1 }
  0xe1   :  { %v681_v37 = vpop.f32.mrf.mxu1 }
  0xe3   :  { %v683_v44 = vpop.f32.mrf.mxu1 }
  0xe5   :  { %v685_v53 = vpop.f32.mrf.mxu1 }
 0x102   :  { %v636_v38 = vpop.f32.mrf.mxu0 }
 0x103   :  { %v637_v39 = vadd.f32 %v636_v38, %v116_v36 }
 0x104   :  { %v638_v40 = vpop.f32.mrf.mxu0 }
 0x105   :  { %v680_v42 = vadd.f32 %v679_v35, %v637_v39  ;;  %v639_v43 = vadd.f32 %v638_v40, %v116_v36 }
 0x106   :  { %v640_v45 = vpop.f32.mrf.mxu0 }
 0x107   :  { %v682_v46 = vadd.f32 %v681_v37, %v639_v43  ;;  %v641_v47 = vadd.f32 %v640_v45, %v121_v41  ;;  %v774_v49 = vmax.f32 %v680_v42, 0.0 }
 0x108   :  { %v642_v48 = vpop.f32.mrf.mxu0 }
 0x109   :  { %v775_v50 = vmax.f32 %v682_v46, 0.0  ;;  %v684_v51 = vadd.f32 %v683_v44, %v641_v47  ;;  %v643_v52 = vadd.f32 %v642_v48, %v121_v41 }
 0x10b   :  { %v915_v31 = vpack.c.bf16 %v775_v50, %v774_v49  ;;  %v686_v54 = vadd.f32 %v685_v53, %v643_v52  ;;  %v778_v55 = vmax.f32 %v684_v51, 0.0 }
 0x10d   :  { %806 = vst [vmem:[%s1399_s3] sm:$0xff] %v915_v31  ;;  %v779_v56 = vmax.f32 %v686_v54, 0.0 }
 0x10f   :  { %v917_v57 = vpack.c.bf16 %v779_v56, %v778_v55 }
 0x111   :  { %808 = vst [vmem:[%s1399_s3 + $0x10] sm:$0xff] %v917_v57 }
 0x11e   :  { %v765_v59 = vpop.f32.mrf.mxu0 }
 0x11f   :  { %v722_v58 = vpop.f32.mrf.mxu1 }
 0x120   :  { %v723_v60 = vadd.f32 %v722_v58, %v116_v36  ;;  %v767_v62 = vpop.f32.mrf.mxu0 }
 0x121   :  { %v724_v61 = vpop.f32.mrf.mxu1 }
 0x122   :  { %v766_v63 = vadd.f32 %v765_v59, %v723_v60  ;;  %v725_v0 = vadd.f32 %v724_v61, %v116_v36  ;;  %v769_v3 = vpop.f32.mrf.mxu0 }
 0x123   :  { %v726_v2 = vpop.f32.mrf.mxu1 }
 0x124   :  { %v768_v4 = vadd.f32 %v767_v62, %v725_v0  ;;  %v727_v5 = vadd.f32 %v726_v2, %v121_v41  ;;  %v776_v7 = vmax.f32 %v766_v63, 0.0  ;;  %v771_v11 = vpop.f32.mrf.mxu0 }
 0x125   :  { %v728_v6 = vpop.f32.mrf.mxu1 }
 0x126   :  { %v777_v8 = vmax.f32 %v768_v4, 0.0  ;;  %v770_v9 = vadd.f32 %v769_v3, %v727_v5  ;;  %v729_v10 = vadd.f32 %v728_v6, %v121_v41 }
 0x128   :  { %v916_v12 = vpack.c.bf16 %v777_v8, %v776_v7  ;;  %v772_v13 = vadd.f32 %v771_v11, %v729_v10  ;;  %v780_v14 = vmax.f32 %v770_v9, 0.0 }
 0x12a   :  { %807 = vst [vmem:[%s1399_s3 + $0x8] sm:$0xff] %v916_v12  ;;  %v781_v15 = vmax.f32 %v772_v13, 0.0 }
 0x12c   :  { %v918_v16 = vpack.c.bf16 %v781_v15, %v780_v14 }
 0x12e   :  { %809 = vst [vmem:[%s1399_s3 + $0x18] sm:$0xff] %v918_v16 }

// kernel: alexnet_forward.5
= control target key start
LH: loop header
LB: loop body
LE: loop exit
PB: predicated region body
PF: predicated region fallthrough
CT: control target
= control target key end

     0   :  { %v540_v0 = vmov 0   ;;  %vm285_vm0 = vcmask 130048   ;;  %s691_s1 = inlined_call_operand.vmem [shape: bf16[400,128], index: 1, kind: input, shape index: {}]   ;;  %s692_s0 = inlined_call_operand.vmem [shape: bf16[32,400], index: 0, kind: input, shape index: {}]   ;;  %s693_s2 = inlined_call_operand.vmem [shape: f32[32,1], index: 2, kind: input, shape index: {}]   ;;  %s694_s3 = inlined_call_operand.vmem [shape: bf16[32,128], index: 3, kind: output, shape index: {}]  }
   0x1   :  { %341 = vmatprep.subr.bf16.mxu1 %v540_v0  ;;  %v503_v1 = vld [vmem:[%s691_s1 + $0x78] sm:$0xff]   ;;  %501 = vset.pattern.permute.xlu0 %v540_v0  ;;  %v506_v4 = vld [vmem:[%s691_s1 + $0x70] sm:$0xff]   ;;  %v509_v7 = vld [vmem:[%s691_s1 + $0x68] sm:$0xff]  }
   0x2   :  { %v504_v2 = vld [vmem:[%s691_s1 + $0xb8] sm:$0xff]   ;;  %502 = vset.pattern.permute.xlu1 %v540_v0  ;;  %472 = vmatprep.subr.bf16.mxu0 %v503_v1  ;;  %v507_v5 = vld [vmem:[%s691_s1 + $0xb0] sm:$0xff]   ;;  %v510_v8 = vld [vmem:[%s691_s1 + $0xa8] sm:$0xff]  }
   0x3   :  { %v505_v3 = vld [vmem:[%s691_s1 + $0x38] sm:$0xff]   ;;  %342 = vmatpush1.bf16.msra.mxu1 %v504_v2  ;;  %v508_v6 = vld [vmem:[%s691_s1 + $0x30] sm:$0xff]   ;;  %v511_v9 = vld [vmem:[%s691_s1 + $0x28] sm:$0xff]  }
   0x4   :  { %473 = vmatpush3.bf16.msra.mxu0 %v505_v3  ;;  %343 = vmatprep.subr.bf16.mxu1 %v540_v0  ;;  %v512_v10 = vld [vmem:[%s691_s1 + $0x60] sm:$0xff]   ;;  %v515_v13 = vld [vmem:[%s691_s1 + $0x58] sm:$0xff]   ;;  %v518_v16 = vld [vmem:[%s691_s1 + $0x50] sm:$0xff]  }
   0x5   :  { %474 = vmatprep.subr.bf16.mxu0 %v506_v4  ;;  %v513_v11 = vld [vmem:[%s691_s1 + $0xa0] sm:$0xff]   ;;  %v516_v14 = vld [vmem:[%s691_s1 + $0x98] sm:$0xff]   ;;  %v519_v17 = vld [vmem:[%s691_s1 + $0x90] sm:$0xff]  }
   0x6   :  { %v514_v12 = vld [vmem:[%s691_s1 + $0x20] sm:$0xff]   ;;  %v517_v15 = vld [vmem:[%s691_s1 + $0x18] sm:$0xff]   ;;  %v520_v18 = vld [vmem:[%s691_s1 + $0x10] sm:$0xff]  }
   0x7   :  { %344 = vmatpush1.bf16.msra.mxu1 %v507_v5  ;;  %v521_v19 = vld [vmem:[%s691_s1 + $0x48] sm:$0xff]   ;;  %v524_v22 = vld [vmem:[%s691_s1 + $0x40] sm:$0xff]   ;;  %v75_v28 = vld [vmem:[%s693_s2 + $0x10] sm:$0xff] }
   0x8   :  { %475 = vmatpush3.bf16.msra.mxu0 %v508_v6  ;;  %345 = vmatprep.subr.bf16.mxu1 %v540_v0  ;;  %v522_v20 = vld [vmem:[%s691_s1 + $0x88] sm:$0xff]   ;;  %v529_v23 = vld [vmem:[%s692_s0 + $0x4] ss:$16 sps:$4 sm:$0xff]   ;;  %v527_v29 = vld [vmem:[%s692_s0] ss:$16 sps:$4 sm:$0xff]  }
   0x9   :  { %476 = vmatprep.subr.bf16.mxu0 %v509_v7  ;;  %v523_v21 = vld [vmem:[%s691_s1 + $0x8] sm:$0xff]   ;;  %v525_v24 = vld [vmem:[%s691_s1 + $0x80] sm:$0xff]   ;;  %324 = vmatprep.mubr.bf16.mxu0 %v529_v23  ;;  %v76_v34 = vld [vmem:[%s693_s2 + $0x18] sm:$0xff] }
   0xa   :  { %v533_v25 = vld [vmem:[%s692_s0 + $0xc] ss:$16 sps:$4 sm:$0xff]   ;;  %v526_v26 = vld [vmem:[%s691_s1] sm:$0xff]   ;;  %89 = vperm.xlu1 %502, %v75_v28   ;;  %v531_v33 = vld [vmem:[%s692_s0 + $0x8] ss:$16 sps:$4 sm:$0xff]  }
   0xb   :  { %346 = vmatpush1.bf16.msra.mxu1 %v510_v8  ;;  %451 = vmatprep.mubr.msk.bf16.mxu1 %vm285_vm0, %v533_v25  ;;  %v73_v27 = vld [vmem:[%s693_s2] sm:$0xff]  ;;  %v74_v32 = vld [vmem:[%s693_s2 + $0x8] sm:$0xff] }
   0xc   :  { %477 = vmatpush3.bf16.msra.mxu0 %v511_v9  ;;  %347 = vmatprep.subr.bf16.mxu1 %v540_v0  ;;  %v530_v30 = vld [vmem:[%s691_s1 + $0xc0] sm:$0xff]   ;;  %v537_v35 = vld [vmem:[%s692_s0 + $0x2c] ss:$16 sps:$4 sm:$0xff]   ;;  %v539_v37 = vld [vmem:[%s692_s0 + $0x28] ss:$16 sps:$4 sm:$0xff]  }
   0xd   :  { %478 = vmatprep.subr.bf16.mxu0 %v512_v10  ;;  %79 = vperm.xlu0 %501, %v73_v27   ;;  %v534_v31 = vld [vmem:[%s692_s0 + $0x24] ss:$16 sps:$4 sm:$0xff]   ;;  %v536_v36 = vld [vmem:[%s692_s0 + $0x20] ss:$16 sps:$4 sm:$0xff]  }
   0xe   :  { %94 = vperm.xlu1 %502, %v76_v34  }
   0xf   :  { %348 = vmatpush1.bf16.msra.mxu1 %v513_v11 }
  0x10   :  { %479 = vmatpush3.bf16.msra.mxu0 %v514_v12  ;;  %349 = vmatprep.subr.bf16.mxu1 %v540_v0 }
  0x11   :  { %480 = vmatprep.subr.bf16.mxu0 %v515_v13  ;;  %84 = vperm.xlu0 %501, %v74_v32  }
  0x13   :  { %350 = vmatpush1.bf16.msra.mxu1 %v516_v14 }
  0x14   :  { %481 = vmatpush3.bf16.msra.mxu0 %v517_v15  ;;  %351 = vmatprep.subr.bf16.mxu1 %v540_v0 }
  0x15   :  { %482 = vmatprep.subr.bf16.mxu0 %v518_v16 }
  0x17   :  { %352 = vmatpush1.bf16.msra.mxu1 %v519_v17 }
  0x18   :  { %483 = vmatpush3.bf16.msra.mxu0 %v520_v18  ;;  %353 = vmatprep.subr.bf16.mxu1 %v540_v0 }
  0x19   :  { %484 = vmatprep.subr.bf16.mxu0 %v521_v19 }
  0x1b   :  { %354 = vmatpush1.bf16.msra.mxu1 %v522_v20 }
  0x1c   :  { %485 = vmatpush3.bf16.msra.mxu0 %v523_v21  ;;  %355 = vmatprep.subr.bf16.mxu1 %v540_v0 }
  0x1d   :  { %486 = vmatprep.subr.bf16.mxu0 %v524_v22 }
  0x1f   :  { %356 = vmatpush1.bf16.msra.mxu1 %v525_v24 }
  0x20   :  { %487 = vmatpush3.bf16.msra.mxu0 %v526_v26  ;;  %371 = vmatprep.subr.bf16.mxu1 %v540_v0 }
  0x23   :  { %325 = vmatmul.mubr.bf16.vlgmr.msra.gmra.mxu0 %v527_v29  ;;  %372 = vmatpush2.bf16.msra.mxu1 %v530_v30 }
  0x24   :  { %332 = vmatprep.mubr.bf16.mxu0 %v534_v31 }
  0x26   :  { %374 = vmatmul.mubr.bf16.vlgmr.msra.gmra.mxu1 %v531_v33 }
  0x27   :  { %452 = vmatprep.mubr.msk.bf16.mxu1 %vm285_vm0, %v537_v35 }
  0x2b   :  { %333 = vmatmul.mubr.bf16.gmra.mxu0 %v536_v36 }
  0x2e   :  { %382 = vmatmul.mubr.bf16.gmra.mxu1 %v539_v37 }
  0x85   :  { %v90_v54 = vpop.permute.xlu1 %89 }
  0x88   :  { %v80_v39 = vpop.permute.xlu0 %79 }
  0x89   :  { %v95_v4 = vpop.permute.xlu1 %94 }
  0x8c   :  { %v85_v47 = vpop.permute.xlu0 %84 }
  0xe3   :  { %v488_v38 = vpop.f32.mrf.mxu0 }
  0xe5   :  { %v489_v40 = vpop.f32.mrf.mxu0 }
  0xe6   :  { %v490_v41 = vadd.f32 %v489_v40, %v488_v38  ;;  %v375_v42 = vpop.f32.mrf.mxu1 }
  0xe7   :  { %v491_v43 = vpop.f32.mrf.mxu0 }
  0xe8   :  { %v327_v44 = vadd.f32 %v490_v41, %v80_v39  ;;  %v377_v45 = vpop.f32.mrf.mxu1 }
  0xe9   :  { %v492_v46 = vpop.f32.mrf.mxu0 }
  0xea   :  { %v493_v48 = vadd.f32 %v492_v46, %v491_v43  ;;  %v378_v49 = vpop.f32.mrf.mxu1  ;;  %v376_v51 = vadd.f32 %v375_v42, %v327_v44 }
  0xeb   :  { %v494_v50 = vpop.f32.mrf.mxu0 }
  0xec   :  { %v330_v52 = vadd.f32 %v493_v48, %v85_v47  ;;  %v380_v53 = vpop.f32.mrf.mxu1  ;;  %v390_v60 = vmax.f32 %v376_v51, 0.0 }
  0xed   :  { %v495_v55 = vpop.f32.mrf.mxu0 }
  0xee   :  { %v379_v56 = vadd.f32 %v378_v49, %v330_v52  ;;  %v496_v57 = vadd.f32 %v495_v55, %v494_v50  ;;  %v383_v58 = vpop.f32.mrf.mxu1 }
  0xef   :  { %v497_v59 = vpop.f32.mrf.mxu0 }
  0xf0   :  { %v391_v61 = vmax.f32 %v379_v56, 0.0  ;;  %v335_v62 = vadd.f32 %v496_v57, %v90_v54  ;;  %v385_v63 = vpop.f32.mrf.mxu1 }
  0xf1   :  { %v498_v0 = vpop.f32.mrf.mxu0 }
  0xf2   :  { %v464_v1 = vpack.c.bf16 %v391_v61, %v390_v60  ;;  %v499_v2 = vadd.f32 %v498_v0, %v497_v59  ;;  %v386_v3 = vpop.f32.mrf.mxu1  ;;  %v384_v5 = vadd.f32 %v383_v58, %v335_v62 }
  0xf4   :  { %v338_v6 = vadd.f32 %v499_v2, %v95_v4  ;;  %465 = vst [vmem:[%s694_s3] sm:$0xff] %v464_v1   ;;  %v388_v7 = vpop.f32.mrf.mxu1  ;;  %v392_v9 = vmax.f32 %v384_v5, 0.0 }
  0xf6   :  { %v387_v8 = vadd.f32 %v386_v3, %v338_v6 }
  0xf8   :  { %v393_v10 = vmax.f32 %v387_v8, 0.0 }
  0xfa   :  { %v469_v11 = vpack.c.bf16 %v393_v10, %v392_v9 }
  0xfc   :  { %471 = vst [vmem:[%s694_s3 + $0x8] sm:$0xff] %v469_v11  }

// kernel: alexnet_forward.6
= control target key start
LH: loop header
LB: loop body
LE: loop exit
PB: predicated region body
PF: predicated region fallthrough
CT: control target
= control target key end

     0   :  { %v468_v1 = vmov 0   ;;  %vm221_vm0 = vcmask 261120   ;;  %s581_s1 = inlined_call_operand.vmem [shape: bf16[288,128], index: 1, kind: input, shape index: {}]   ;;  %s582_s0 = inlined_call_operand.vmem [shape: bf16[32,288], index: 0, kind: input, shape index: {}]   ;;  %s583_s2 = inlined_call_operand.vmem [shape: f32[32,1], index: 2, kind: input, shape index: {}]   ;;  %s584_s3 = inlined_call_operand.vmem [shape: bf16[32,128], index: 3, kind: output, shape index: {}]  }
   0x1   :  { %v442_v0 = vld [vmem:[%s581_s1 + $0x78] sm:$0xff]   ;;  %440 = vset.pattern.permute.xlu0 %v468_v1  ;;  %441 = vset.pattern.permute.xlu1 %v468_v1  ;;  %v444_v3 = vld [vmem:[%s581_s1 + $0x70] sm:$0xff]   ;;  %v446_v5 = vld [vmem:[%s581_s1 + $0x68] sm:$0xff]  }
   0x2   :  { %v443_v2 = vld [vmem:[%s581_s1 + $0x38] sm:$0xff]   ;;  %399 = vmatprep.subr.bf16.mxu0 %v442_v0  ;;  %v445_v4 = vld [vmem:[%s581_s1 + $0x30] sm:$0xff]   ;;  %v447_v6 = vld [vmem:[%s581_s1 + $0x28] sm:$0xff]  }
   0x3   :  { %400 = vmatpush3.bf16.msra.mxu0 %v443_v2  ;;  %v448_v7 = vld [vmem:[%s581_s1 + $0x60] sm:$0xff]   ;;  %v450_v9 = vld [vmem:[%s581_s1 + $0x58] sm:$0xff]   ;;  %v457_v11 = vld [vmem:[%s581_s1 + $0x88] sm:$0xff]  }
   0x4   :  { %401 = vmatprep.subr.bf16.mxu0 %v444_v3  ;;  %v449_v8 = vld [vmem:[%s581_s1 + $0x20] sm:$0xff]   ;;  %v451_v10 = vld [vmem:[%s581_s1 + $0x18] sm:$0xff]   ;;  %v452_v12 = vld [vmem:[%s581_s1 + $0x50] sm:$0xff]   ;;  %431 = vmatprep.subr.bf16.mxu1 %v457_v11 }
   0x5   :  { %v453_v13 = vld [vmem:[%s581_s1 + $0x10] sm:$0xff]   ;;  %v454_v14 = vld [vmem:[%s581_s1 + $0x48] sm:$0xff]   ;;  %432 = vmatpush3.bf16.msra.mxu1 %v457_v11  ;;  %v462_v16 = vld [vmem:[%s581_s1 + $0x80] sm:$0xff]  }
   0x6   :  { %v461_v15 = vld [vmem:[%s582_s0 + $0x4] ss:$12 sps:$4 sm:$0xff]   ;;  %v463_v17 = vld [vmem:[%s582_s0 + $0x8] ss:$12 sps:$4 sm:$0xff]   ;;  %433 = vmatprep.subr.bf16.mxu1 %v462_v16  ;;  %v464_v18 = vld [vmem:[%s582_s0 + $0x20] ss:$12 sps:$4 sm:$0xff]  }
   0x7   :  { %402 = vmatpush3.bf16.msra.mxu0 %v445_v4  ;;  %260 = vmatprep.mubr.bf16.mxu0 %v461_v15  ;;  %v59_v19 = vld [vmem:[%s583_s2] sm:$0xff]  ;;  %v455_v20 = vld [vmem:[%s581_s1 + $0x8] sm:$0xff]   ;;  %v61_v21 = vld [vmem:[%s583_s2 + $0x10] sm:$0xff] }
   0x8   :  { %403 = vmatprep.subr.bf16.mxu0 %v446_v5  ;;  %435 = vmatprep.mubr.msk.bf16.mxu1 %vm221_vm0, %v463_v17  ;;  %v456_v22 = vld [vmem:[%s581_s1 + $0x40] sm:$0xff]   ;;  %v60_v23 = vld [vmem:[%s583_s2 + $0x8] sm:$0xff]  ;;  %v62_v24 = vld [vmem:[%s583_s2 + $0x18] sm:$0xff] }
   0x9   :  { %434 = vmatpush3.bf16.msra.mxu1 %v462_v16  ;;  %65 = vperm.xlu0 %440, %v59_v19   ;;  %v458_v25 = vld [vmem:[%s581_s1] sm:$0xff]   ;;  %v465_v27 = vld [vmem:[%s582_s0 + $0x1c] ss:$12 sps:$4 sm:$0xff]  }
   0xa   :  { %75 = vperm.xlu1 %441, %v61_v21   ;;  %v459_v26 = vld [vmem:[%s582_s0] ss:$12 sps:$4 sm:$0xff]   ;;  %v467_v28 = vld [vmem:[%s582_s0 + $0x18] ss:$12 sps:$4 sm:$0xff]  }
   0xb   :  { %404 = vmatpush3.bf16.msra.mxu0 %v447_v6 }
   0xc   :  { %405 = vmatprep.subr.bf16.mxu0 %v448_v7  ;;  %436 = vmatmul.mubr.msk.bf16.vlgmr.msra.gmra.mxu1 %vm221_vm0, %v464_v18 }
   0xd   :  { %70 = vperm.xlu0 %440, %v60_v23  }
   0xe   :  { %80 = vperm.xlu1 %441, %v62_v24  }
   0xf   :  { %406 = vmatpush3.bf16.msra.mxu0 %v449_v8 }
  0x10   :  { %407 = vmatprep.subr.bf16.mxu0 %v450_v9 }
  0x13   :  { %408 = vmatpush3.bf16.msra.mxu0 %v451_v10 }
  0x14   :  { %409 = vmatprep.subr.bf16.mxu0 %v452_v12 }
  0x17   :  { %410 = vmatpush3.bf16.msra.mxu0 %v453_v13 }
  0x18   :  { %411 = vmatprep.subr.bf16.mxu0 %v454_v14 }
  0x1b   :  { %412 = vmatpush3.bf16.msra.mxu0 %v455_v20 }
  0x1c   :  { %413 = vmatprep.subr.bf16.mxu0 %v456_v22 }
  0x1f   :  { %414 = vmatpush3.bf16.msra.mxu0 %v458_v25 }
  0x22   :  { %261 = vmatmul.mubr.bf16.vlgmr.msra.gmra.mxu0 %v459_v26 }
  0x23   :  { %268 = vmatprep.mubr.bf16.mxu0 %v465_v27 }
  0x2a   :  { %269 = vmatmul.mubr.bf16.gmra.mxu0 %v467_v28 }
  0x84   :  { %v66_v30 = vpop.permute.xlu0 %65 }
  0x85   :  { %v76_v45 = vpop.permute.xlu1 %75 }
  0x88   :  { %v71_v39 = vpop.permute.xlu0 %70 }
  0x89   :  { %v81_v56 = vpop.permute.xlu1 %80 }
  0xcc   :  { %v437_v29 = vpop.f32.mrf.mxu1 }
  0xce   :  { %v311_v32 = vpop.f32.mrf.mxu1 }
  0xd0   :  { %v438_v36 = vpop.f32.mrf.mxu1 }
  0xd2   :  { %v314_v42 = vpop.f32.mrf.mxu1 }
  0xe2   :  { %v415_v31 = vpop.f32.mrf.mxu0 }
  0xe4   :  { %v416_v33 = vpop.f32.mrf.mxu0 }
  0xe5   :  { %v417_v34 = vadd.f32 %v416_v33, %v415_v31 }
  0xe6   :  { %v418_v35 = vpop.f32.mrf.mxu0 }
  0xe7   :  { %v263_v37 = vadd.f32 %v417_v34, %v66_v30 }
  0xe8   :  { %v419_v38 = vpop.f32.mrf.mxu0 }
  0xe9   :  { %v420_v40 = vadd.f32 %v419_v38, %v418_v35  ;;  %v312_v43 = vadd.f32 %v311_v32, %v263_v37 }
  0xea   :  { %v421_v41 = vpop.f32.mrf.mxu0 }
  0xeb   :  { %v266_v44 = vadd.f32 %v420_v40, %v71_v39  ;;  %v326_v50 = vmax.f32 %v312_v43, 0.0 }
  0xec   :  { %v422_v46 = vpop.f32.mrf.mxu0 }
  0xed   :  { %v423_v47 = vadd.f32 %v422_v46, %v421_v41  ;;  %v315_v48 = vadd.f32 %v314_v42, %v266_v44 }
  0xee   :  { %v424_v49 = vpop.f32.mrf.mxu0 }
  0xef   :  { %v271_v51 = vadd.f32 %v423_v47, %v76_v45  ;;  %v327_v52 = vmax.f32 %v315_v48, 0.0 }
  0xf0   :  { %v425_v53 = vpop.f32.mrf.mxu0 }
  0xf1   :  { %v391_v54 = vpack.c.bf16 %v327_v52, %v326_v50  ;;  %v426_v55 = vadd.f32 %v425_v53, %v424_v49  ;;  %v320_v57 = vadd.f32 %v437_v29, %v271_v51 }
  0xf3   :  { %392 = vst [vmem:[%s584_s3] sm:$0xff] %v391_v54   ;;  %v274_v58 = vadd.f32 %v426_v55, %v81_v56  ;;  %v328_v60 = vmax.f32 %v320_v57, 0.0 }
  0xf5   :  { %v323_v59 = vadd.f32 %v438_v36, %v274_v58 }
  0xf7   :  { %v329_v61 = vmax.f32 %v323_v59, 0.0 }
  0xf9   :  { %v396_v62 = vpack.c.bf16 %v329_v61, %v328_v60 }
  0xfb   :  { %398 = vst [vmem:[%s584_s3 + $0x8] sm:$0xff] %v396_v62  }

// kernel: alexnet_forward.7
= control target key start
LH: loop header
LB: loop body
LE: loop exit
PB: predicated region body
PF: predicated region fallthrough
CT: control target
= control target key end

     0   :  { %v662_v1 = vmov 0   ;;  %vm283_vm0 = vcmask 261120   ;;  %s813_s1 = inlined_call_operand.vmem [shape: bf16[288,128], index: 1, kind: input, shape index: {}]   ;;  %s814_s0 = inlined_call_operand.vmem [shape: bf16[64,288], index: 0, kind: input, shape index: {}]   ;;  %s815_s2 = inlined_call_operand.vmem [shape: f32[64,1], index: 2, kind: input, shape index: {}]   ;;  %s816_s3 = inlined_call_operand.vmem [shape: bf16[64,128], index: 3, kind: output, shape index: {}]  }
   0x1   :  { %v628_v0 = vld [vmem:[%s813_s1 + $0x78] sm:$0xff]   ;;  %626 = vset.pattern.permute.xlu0 %v662_v1  ;;  %627 = vset.pattern.permute.xlu1 %v662_v1  ;;  %v630_v3 = vld [vmem:[%s813_s1 + $0x70] sm:$0xff]   ;;  %v632_v5 = vld [vmem:[%s813_s1 + $0x68] sm:$0xff]  }
   0x2   :  { %v629_v2 = vld [vmem:[%s813_s1 + $0x38] sm:$0xff]   ;;  %551 = vmatprep.subr.bf16.mxu0 %v628_v0  ;;  %609 = vmatprep.subr.bf16.mxu1 %v628_v0  ;;  %v631_v4 = vld [vmem:[%s813_s1 + $0x30] sm:$0xff]   ;;  %v633_v6 = vld [vmem:[%s813_s1 + $0x28] sm:$0xff]  }
   0x3   :  { %552 = vmatpush3.bf16.msra.mxu0 %v629_v2  ;;  %617 = vmatpush3.bf16.msra.mxu1 %v629_v2  ;;  %v634_v7 = vld [vmem:[%s813_s1 + $0x60] sm:$0xff]   ;;  %v636_v9 = vld [vmem:[%s813_s1 + $0x58] sm:$0xff]   ;;  %v638_v11 = vld [vmem:[%s813_s1 + $0x50] sm:$0xff]  }
   0x4   :  { %553 = vmatprep.subr.bf16.mxu0 %v630_v3  ;;  %610 = vmatprep.subr.bf16.mxu1 %v630_v3  ;;  %v635_v8 = vld [vmem:[%s813_s1 + $0x20] sm:$0xff]   ;;  %v637_v10 = vld [vmem:[%s813_s1 + $0x18] sm:$0xff]   ;;  %v639_v14 = vld [vmem:[%s813_s1 + $0x10] sm:$0xff]  }
   0x5   :  { %v646_v12 = vld [vmem:[%s814_s0 + $0x4] ss:$12 sps:$4 sm:$0xff]   ;;  %v649_v13 = vld [vmem:[%s814_s0 + $0x4c] ss:$12 sps:$4 sm:$0xff]   ;;  %v647_v23 = vld [vmem:[%s814_s0 + $0x48] ss:$12 sps:$4 sm:$0xff]  }
   0x6   :  { %v640_v15 = vld [vmem:[%s813_s1 + $0x48] sm:$0xff]   ;;  %328 = vmatprep.mubr.bf16.mxu0 %v646_v12  ;;  %352 = vmatprep.mubr.bf16.mxu1 %v649_v13  ;;  %v642_v17 = vld [vmem:[%s813_s1 + $0x40] sm:$0xff]   ;;  %v69_v20 = vld [vmem:[%s815_s2 + $0x10] sm:$0xff] }
   0x7   :  { %554 = vmatpush3.bf16.msra.mxu0 %v631_v4  ;;  %618 = vmatpush3.bf16.msra.mxu1 %v631_v4  ;;  %v641_v16 = vld [vmem:[%s813_s1 + $0x8] sm:$0xff]   ;;  %v643_v18 = vld [vmem:[%s813_s1] sm:$0xff]   ;;  %v70_v25 = vld [vmem:[%s815_s2 + $0x18] sm:$0xff] }
   0x8   :  { %555 = vmatprep.subr.bf16.mxu0 %v632_v5  ;;  %611 = vmatprep.subr.bf16.mxu1 %v632_v5  ;;  %v67_v19 = vld [vmem:[%s815_s2] sm:$0xff]  ;;  %v650_v21 = vld [vmem:[%s813_s1 + $0x88] sm:$0xff]   ;;  %v73_v33 = vld [vmem:[%s815_s2 + $0x30] sm:$0xff] }
   0x9   :  { %v644_v22 = vld [vmem:[%s814_s0] ss:$12 sps:$4 sm:$0xff]   ;;  %77 = vperm.xlu0 %626, %v67_v19   ;;  %87 = vperm.xlu1 %627, %v69_v20   ;;  %v652_v26 = vld [vmem:[%s814_s0 + $0x1c] ss:$12 sps:$4 sm:$0xff]   ;;  %v655_v31 = vld [vmem:[%s814_s0 + $0x18] ss:$12 sps:$4 sm:$0xff]  }
   0xa   :  { %v68_v24 = vld [vmem:[%s815_s2 + $0x8] sm:$0xff]  ;;  %v651_v27 = vld [vmem:[%s813_s1 + $0x80] sm:$0xff]   ;;  %v74_v34 = vld [vmem:[%s815_s2 + $0x38] sm:$0xff] }
   0xb   :  { %556 = vmatpush3.bf16.msra.mxu0 %v633_v6  ;;  %619 = vmatpush3.bf16.msra.mxu1 %v633_v6  ;;  %v654_v28 = vld [vmem:[%s814_s0 + $0x8] ss:$12 sps:$4 sm:$0xff]   ;;  %v71_v29 = vld [vmem:[%s815_s2 + $0x20] sm:$0xff]  ;;  %v660_v37 = vld [vmem:[%s814_s0 + $0x30] ss:$12 sps:$4 sm:$0xff]  }
   0xc   :  { %557 = vmatprep.subr.bf16.mxu0 %v634_v7  ;;  %612 = vmatprep.subr.bf16.mxu1 %v634_v7  ;;  %v72_v30 = vld [vmem:[%s815_s2 + $0x28] sm:$0xff]  ;;  %v657_v35 = vld [vmem:[%s814_s0 + $0x34] ss:$12 sps:$4 sm:$0xff]   ;;  %v659_v36 = vld [vmem:[%s814_s0 + $0x38] ss:$12 sps:$4 sm:$0xff]  }
   0xd   :  { %82 = vperm.xlu0 %626, %v68_v24   ;;  %92 = vperm.xlu1 %627, %v70_v25   ;;  %v656_v32 = vld [vmem:[%s814_s0 + $0x20] ss:$12 sps:$4 sm:$0xff]   ;;  %v661_v38 = vld [vmem:[%s814_s0 + $0x50] ss:$12 sps:$4 sm:$0xff]  }
   0xf   :  { %558 = vmatpush3.bf16.msra.mxu0 %v635_v8  ;;  %620 = vmatpush3.bf16.msra.mxu1 %v635_v8 }
  0x10   :  { %559 = vmatprep.subr.bf16.mxu0 %v636_v9  ;;  %613 = vmatprep.subr.bf16.mxu1 %v636_v9 }
  0x11   :  { %97 = vperm.xlu0 %626, %v71_v29   ;;  %102 = vperm.xlu1 %627, %v72_v30  }
  0x13   :  { %560 = vmatpush3.bf16.msra.mxu0 %v637_v10  ;;  %621 = vmatpush3.bf16.msra.mxu1 %v637_v10 }
  0x14   :  { %561 = vmatprep.subr.bf16.mxu0 %v638_v11  ;;  %614 = vmatprep.subr.bf16.mxu1 %v638_v11 }
  0x15   :  { %107 = vperm.xlu0 %626, %v73_v33   ;;  %112 = vperm.xlu1 %627, %v74_v34  }
  0x17   :  { %562 = vmatpush3.bf16.msra.mxu0 %v639_v14  ;;  %622 = vmatpush3.bf16.msra.mxu1 %v639_v14 }
  0x18   :  { %563 = vmatprep.subr.bf16.mxu0 %v640_v15  ;;  %615 = vmatprep.subr.bf16.mxu1 %v640_v15 }
  0x1b   :  { %564 = vmatpush3.bf16.msra.mxu0 %v641_v16  ;;  %623 = vmatpush3.bf16.msra.mxu1 %v641_v16 }
  0x1c   :  { %565 = vmatprep.subr.bf16.mxu0 %v642_v17  ;;  %616 = vmatprep.subr.bf16.mxu1 %v642_v17 }
  0x1f   :  { %566 = vmatpush3.bf16.msra.mxu0 %v643_v18  ;;  %624 = vmatpush3.bf16.msra.mxu1 %v643_v18 }
  0x20   :  { %597 = vmatprep.subr.bf16.mxu1 %v650_v21 }
  0x22   :  { %329 = vmatmul.mubr.bf16.vlgmr.msra.gmra.mxu0 %v644_v22  ;;  %353 = vmatmul.mubr.bf16.vlgmr.msra.gmra.mxu1 %v647_v23 }
  0x23   :  { %598 = vmatpush3.bf16.msra.mxu1 %v650_v21  ;;  %336 = vmatprep.mubr.bf16.mxu0 %v652_v26 }
  0x24   :  { %599 = vmatprep.subr.bf16.mxu1 %v651_v27  ;;  %601 = vmatprep.mubr.msk.bf16.mxu1 %vm283_vm0, %v654_v28 }
  0x27   :  { %600 = vmatpush3.bf16.msra.mxu1 %v651_v27 }
  0x2a   :  { %337 = vmatmul.mubr.bf16.gmra.mxu0 %v655_v31  ;;  %602 = vmatmul.mubr.msk.bf16.vlgmr.msra.gmra.mxu1 %vm283_vm0, %v656_v32 }
  0x2b   :  { %344 = vmatprep.mubr.bf16.mxu0 %v657_v35  ;;  %605 = vmatprep.mubr.msk.bf16.mxu1 %vm283_vm0, %v659_v36 }
  0x32   :  { %345 = vmatmul.mubr.bf16.gmra.mxu0 %v660_v37  ;;  %606 = vmatmul.mubr.msk.bf16.gmra.mxu1 %vm283_vm0, %v661_v38 }
  0x84   :  { %v78_v39 = vpop.permute.xlu0 %77  ;;  %v88_v40 = vpop.permute.xlu1 %87 }
  0x88   :  { %v83_v43 = vpop.permute.xlu0 %82  ;;  %v93_v46 = vpop.permute.xlu1 %92 }
  0x8c   :  { %v98_v51 = vpop.permute.xlu0 %97  ;;  %v103_v55 = vpop.permute.xlu1 %102 }
  0x90   :  { %v108_v0 = vpop.permute.xlu0 %107  ;;  %v113_v7 = vpop.permute.xlu1 %112 }
  0xe2   :  { %v567_v41 = vpop.f32.mrf.mxu0  ;;  %v585_v42 = vpop.f32.mrf.mxu1 }
  0xe4   :  { %v568_v44 = vpop.f32.mrf.mxu0  ;;  %v586_v45 = vpop.f32.mrf.mxu1 }
  0xe5   :  { %v569_v52 = vadd.f32 %v568_v44, %v567_v41  ;;  %v587_v61 = vadd.f32 %v586_v45, %v585_v42 }
  0xe6   :  { %v570_v47 = vpop.f32.mrf.mxu0  ;;  %v588_v48 = vpop.f32.mrf.mxu1 }
  0xe7   :  { %v331_v60 = vadd.f32 %v569_v52, %v78_v39  ;;  %v355_v10 = vadd.f32 %v587_v61, %v108_v0 }
  0xe8   :  { %v571_v49 = vpop.f32.mrf.mxu0  ;;  %v589_v50 = vpop.f32.mrf.mxu1 }
  0xe9   :  { %v572_v56 = vadd.f32 %v571_v49, %v570_v47  ;;  %v590_v4 = vadd.f32 %v589_v50, %v588_v48 }
  0xea   :  { %v573_v53 = vpop.f32.mrf.mxu0  ;;  %v603_v54 = vpop.f32.mrf.mxu1 }
  0xeb   :  { %v334_v3 = vadd.f32 %v572_v56, %v83_v43  ;;  %v358_v17 = vadd.f32 %v590_v4, %v113_v7 }
  0xec   :  { %v574_v57 = vpop.f32.mrf.mxu0  ;;  %v395_v58 = vpop.f32.mrf.mxu1 }
  0xed   :  { %v575_v59 = vadd.f32 %v574_v57, %v573_v53  ;;  %v396_v2 = vadd.f32 %v395_v58, %v331_v60 }
  0xee   :  { %v576_v62 = vpop.f32.mrf.mxu0  ;;  %v604_v63 = vpop.f32.mrf.mxu1 }
  0xef   :  { %v339_v1 = vadd.f32 %v575_v59, %v88_v40  ;;  %v426_v14 = vmax.f32 %v396_v2, 0.0 }
  0xf0   :  { %v577_v5 = vpop.f32.mrf.mxu0  ;;  %v398_v6 = vpop.f32.mrf.mxu1 }
  0xf1   :  { %v578_v8 = vadd.f32 %v577_v5, %v576_v62  ;;  %v399_v9 = vadd.f32 %v398_v6, %v334_v3  ;;  %v404_v13 = vadd.f32 %v603_v54, %v339_v1 }
  0xf2   :  { %v579_v11 = vpop.f32.mrf.mxu0  ;;  %v607_v12 = vpop.f32.mrf.mxu1 }
  0xf3   :  { %v342_v15 = vadd.f32 %v578_v8, %v93_v46  ;;  %v427_v16 = vmax.f32 %v399_v9, 0.0  ;;  %v420_v22 = vadd.f32 %v607_v12, %v355_v10  ;;  %v428_v26 = vmax.f32 %v404_v13, 0.0 }
  0xf4   :  { %v580_v18 = vpop.f32.mrf.mxu0  ;;  %v411_v19 = vpop.f32.mrf.mxu1 }
  0xf5   :  { %v407_v20 = vadd.f32 %v604_v63, %v342_v15  ;;  %v531_v21 = vpack.c.bf16 %v427_v16, %v426_v14  ;;  %v581_v23 = vadd.f32 %v580_v18, %v579_v11  ;;  %v432_v32 = vmax.f32 %v420_v22, 0.0 }
  0xf6   :  { %v582_v24 = vpop.f32.mrf.mxu0  ;;  %v608_v25 = vpop.f32.mrf.mxu1 }
  0xf7   :  { %v429_v27 = vmax.f32 %v407_v20, 0.0  ;;  %532 = vst [vmem:[%s816_s3] sm:$0xff] %v531_v21   ;;  %v347_v28 = vadd.f32 %v581_v23, %v98_v51  ;;  %v423_v29 = vadd.f32 %v608_v25, %v358_v17 }
  0xf8   :  { %v583_v30 = vpop.f32.mrf.mxu0  ;;  %v414_v38 = vpop.f32.mrf.mxu1 }
  0xf9   :  { %v536_v31 = vpack.c.bf16 %v429_v27, %v428_v26  ;;  %v433_v33 = vmax.f32 %v423_v29, 0.0  ;;  %v584_v34 = vadd.f32 %v583_v30, %v582_v24  ;;  %v412_v35 = vadd.f32 %v411_v19, %v347_v28 }
  0xfb   :  { %548 = vst [vmem:[%s816_s3 + $0x8] sm:$0xff] %v536_v31   ;;  %v546_v36 = vpack.c.bf16 %v433_v33, %v432_v32  ;;  %v350_v37 = vadd.f32 %v584_v34, %v103_v55  ;;  %v430_v40 = vmax.f32 %v412_v35, 0.0 }
  0xfd   :  { %550 = vst [vmem:[%s816_s3 + $0x18] sm:$0xff] %v546_v36   ;;  %v415_v39 = vadd.f32 %v414_v38, %v350_v37 }
  0xff   :  { %v431_v41 = vmax.f32 %v415_v39, 0.0 }
 0x101   :  { %v541_v42 = vpack.c.bf16 %v431_v41, %v430_v40 }
 0x103   :  { %549 = vst [vmem:[%s816_s3 + $0x10] sm:$0xff] %v541_v42  }

</bundles_post_ra>
